<compile_context>
chip_gen: v6e
topology: v6e:2x2x1
jax: 0.10.0
libtpu: 0.0.40
codegen_flags: <defaults>
</compile_context>

<pallas_src>
import jax
import jax.numpy as jnp
from jax import lax
from jax.experimental import pallas as pl
from jax.experimental.pallas import tpu as pltpu


def _round_up(x: int, m: int) -> int:
    return (x + m - 1) // m * m


def _projector_kernel(x_ref, w_ref, o_ref):
    """o[i, j] = x_tile @ w_tile.T (single MXU dot per tile, f32 accumulation)."""
    # x_ref: [tm, K], w_ref: [tn, K] (nn.Linear layout), o_ref: [tm, tn]
    o_ref[...] = lax.dot_general(
        x_ref[...],
        w_ref[...],
        dimension_numbers=(((1,), (1,)), ((), ())),  # contract K with K (x @ W.T)
        preferred_element_type=jnp.float32,
    ).astype(o_ref.dtype)


def _pick_tiles(M, K, N, x_item, w_item, o_item):
    """Pick (tm, tn) for lane-dense, VMEM-budgeted tiles with clean tiling."""
    tm = min(256, _round_up(M, 8))
    if N % 128 == 0:
        tn = min(N, 2048)
        while N % tn != 0:  # largest 128-multiple that divides N
            tn -= 128
    else:
        tn = N  # full-extent block is always legal

    def vmem_bytes(tm_, tn_):
        # double-buffered x tile + weight tile + output tile
        return 2 * (tm_ * K * x_item + tn_ * K * w_item + tm_ * tn_ * o_item)

    budget = 40 * (1 << 20)  # headroom under v7x's 64 MiB physical VMEM
    while (vmem_bytes(tm, tn) > budget and tn > 128
           and (tn // 2) % 128 == 0 and N % (tn // 2) == 0):
        tn //= 2
    while vmem_bytes(tm, tn) > budget and tm > 8 and (tm // 2) % 8 == 0:
        tm //= 2

    # Keep >= 2 grid blocks when possible so both v7x TensorCores get work.
    if pl.cdiv(M, tm) * (N // tn) < 2:
        if tn > 128 and (tn // 2) % 128 == 0 and N % (tn // 2) == 0:
            tn //= 2
        elif tm >= 16 and (tm // 2) % 8 == 0:
            tm //= 2

    return tm, tn


def paligemma_multimodal_projector(
    pixel_values: jax.Array,   # [B, S, image_emb]
    weight: jax.Array,         # [projection_dim, image_emb]  (nn.Linear layout)
    *,
    compute_dtype=None,        # e.g. jnp.bfloat16 to halve HBM traffic
    tm: int | None = None,
    tn: int | None = None,
) -> jax.Array:
    B, S, d_in = pixel_values.shape
    d_out, d_in_w = weight.shape
    assert d_in == d_in_w, "image_emb mismatch between input and weight"

    if compute_dtype is not None:
        pixel_values = pixel_values.astype(compute_dtype)
        weight = weight.astype(compute_dtype)
    out_dtype = pixel_values.dtype

    M, K, N = B * S, d_in, d_out
    x2d = pixel_values.reshape(M, K)

    tm_auto, tn_auto = _pick_tiles(
        M, K, N,
        x2d.dtype.itemsize, weight.dtype.itemsize, jnp.dtype(out_dtype).itemsize,
    )
    if tm is None:
        tm = tm_auto
    if tn is None:
        tn = tn_auto
    assert tm % 8 == 0 and (tn % 128 == 0 or tn == N) and N % tn == 0

    # Pad ragged M up to a tile multiple; extra rows are sliced off below.
    M_pad = _round_up(M, tm)
    if M_pad != M:
        x2d = jnp.pad(x2d, ((0, M_pad - M), (0, 0)))

    grid = (M_pad // tm, N // tn)

    # Explicit VMEM budget from the tile arithmetic (double-buffered tiles).
    vmem_needed = 2 * (tm * K * x2d.dtype.itemsize
                       + tn * K * weight.dtype.itemsize
                       + tm * tn * jnp.dtype(out_dtype).itemsize)
    vmem_limit = min(max(vmem_needed + (4 << 20), 16 << 20), 60 << 20)

    out2d = pl.pallas_call(
        _projector_kernel,
        out_shape=jax.ShapeDtypeStruct((M_pad, N), out_dtype),
        grid_spec=pltpu.PrefetchScalarGridSpec(
            num_scalar_prefetch=0,
            grid=grid,
            in_specs=[
                pl.BlockSpec((tm, K), lambda i, j: (i, 0)),   # x rows, full K
                pl.BlockSpec((tn, K), lambda i, j: (j, 0)),   # W rows (nn.Linear layout)
            ],
            out_specs=pl.BlockSpec((tm, tn), lambda i, j: (i, j)),
        ),
        compiler_params=pltpu.CompilerParams(
            dimension_semantics=("parallel", "parallel"),
            vmem_limit_bytes=vmem_limit,
        ),
    )(x2d, weight)

    if M_pad != M:
        out2d = out2d[:M]
    return out2d.reshape(B, S, N)


if __name__ == "__main__":
    # Small, deterministic shapes consistent with the module:
    #   batch=2, num_image_tokens (seq)=16, vision hidden (image_emb)=128,
    #   projection_dim=256.
    B, S = 2, 16
    image_emb = 128
    projection_dim = 256

    key = jax.random.PRNGKey(0)
    kx, kw = jax.random.split(key)

    pixel_values = jax.random.normal(kx, (B, S, image_emb), dtype=jnp.float32)
    # nn.Linear weight layout: [out_features, in_features]
    weight = (
        jax.random.normal(kw, (projection_dim, image_emb), dtype=jnp.float32)
        * 0.02
    )

    # f32 path — strict reference check (same math as torch's x @ W.T).
    out = paligemma_multimodal_projector(pixel_values, weight)
    out = jax.block_until_ready(out)
    ref = jnp.einsum("bsd,nd->bsn", pixel_values, weight)
    assert out.shape == (B, S, projection_dim)
    assert jnp.allclose(out, ref, atol=1e-4, rtol=1e-4)

    # bf16 data-movement path (half the HBM traffic; f32 MXU accumulation).
    out_bf16 = paligemma_multimodal_projector(
        pixel_values, weight, compute_dtype=jnp.bfloat16
    )
    out_bf16 = jax.block_until_ready(out_bf16)
    ref_bf16 = jnp.einsum(
        "bsd,nd->bsn",
        pixel_values.astype(jnp.bfloat16),
        weight.astype(jnp.bfloat16),
    )
    assert out_bf16.dtype == jnp.bfloat16
    assert jnp.allclose(
        out_bf16.astype(jnp.float32),
        ref_bf16.astype(jnp.float32),
        atol=2e-2,
        rtol=2e-2,
    )

    print("KERNEL_OK")
</pallas_src>

<mosaic_0001>
module attributes {stable_mosaic.version = 11 : i64} {
  func.func @_projector_kernel(%arg0: i32, %arg1: i32, %arg2: memref<32x128xf32, #tpu.memory_space<vmem>>, %arg3: memref<128x128xf32, #tpu.memory_space<vmem>>, %arg4: memref<32x128xf32, #tpu.memory_space<vmem>>) attributes {dimension_semantics = [#tpu.dimension_semantics<parallel>, #tpu.dimension_semantics<parallel>], iteration_bounds = array<i64: 1, 2>, scalar_prefetch = 0 : i64, scratch_operands = 0 : i64, tpu.core_type = #tpu.core_type<tc>, window_params = [{transform_indices = @transform_0, window_bounds = array<i64: 32, 128>}, {transform_indices = @transform_1, window_bounds = array<i64: 128, 128>}, {transform_indices = @transform_2, window_bounds = array<i64: 32, 128>}]} {
    %c0 = arith.constant 0 : index
    %c0_0 = arith.constant 0 : index
    %0 = vector.load %arg2[%c0, %c0_0] : memref<32x128xf32, #tpu.memory_space<vmem>>, vector<32x128xf32>
    %c0_1 = arith.constant 0 : index
    %c0_2 = arith.constant 0 : index
    %1 = vector.load %arg3[%c0_1, %c0_2] : memref<128x128xf32, #tpu.memory_space<vmem>>, vector<128x128xf32>
    %cst = arith.constant dense<0.000000e+00> : vector<32x128xf32>
    %2 = tpu.matmul %0, %1, %cst {dimension_numbers = #tpu.dot_dimension_numbers<[1], [1], [0], [0], [0, 0, 1, 0], [], []>} : vector<32x128xf32>, vector<128x128xf32>, vector<32x128xf32> -> vector<32x128xf32>
    %c0_3 = arith.constant 0 : index
    %c0_4 = arith.constant 0 : index
    %3 = vector.load %arg4[%c0_3, %c0_4] : memref<32x128xf32, #tpu.memory_space<vmem>>, vector<32x128xf32>
    tpu.vector_store %arg4[%c0_3, %c0_4], %2 {strides = array<i32>} : memref<32x128xf32, #tpu.memory_space<vmem>>, vector<32x128xf32>,
    return
  }
  func.func @transform_0(%arg0: i32, %arg1: i32) -> (i32, i32) {
    %c0_i32 = arith.constant 0 : i32
    %c0_i32_0 = arith.constant 0 : i32
    return %arg0, %c0_i32 : i32, i32
  }
  func.func @transform_1(%arg0: i32, %arg1: i32) -> (i32, i32) {
    %c0_i32 = arith.constant 0 : i32
    %c0_i32_0 = arith.constant 0 : i32
    return %arg1, %c0_i32 : i32, i32
  }
  func.func @transform_2(%arg0: i32, %arg1: i32) -> (i32, i32) {
    %c0_i32 = arith.constant 0 : i32
    return %arg0, %arg1 : i32, i32
  }
}

</mosaic_0001>

<bundles_post_ra>
// kernel: tpu_custom_call.1
= control target key start
LH: loop header
LB: loop body
LE: loop exit
PB: predicated region body
PF: predicated region fallthrough
CT: control target
= control target key end

     0   :  { %7 = vsyncpa [#allocation3], 0  ;;  %s978_s0 = inlined_call_operand.hbm [shape: f32[32,128], index: 0, kind: input, shape index: {}]   ;;  %s979_s1 = inlined_call_operand.hbm [shape: f32[256,128], index: 1, kind: input, shape index: {}]   ;;  %s980_s2 = inlined_call_operand.hbm [shape: f32[32,256], index: 2, kind: output, shape index: {}]  }
   0x1   :  { %8 = vsyncpa [#allocation6], 0 }
   0x2   :  { %10 = vsyncpa [#allocation6 + $0x1], 0 }
   0x3   :  { %11 = vsyncpa [#allocation4], 0 }
   0x4   :  { %13 = vsyncpa [#allocation4 + $0x1], 0  ;;  %s772_s9 = smov 0   ;;  %s774_s10 = smov 0  }
   0x5   :  { %s776_s11 = smov 0   ;;  %s778_s12 = smov 0  }
   0x6   :  { %s780_s13 = smov 0   ;;  %s782_s14 = smov 0  }
   0x7 LB: > { %s424_s15 = sadd.s32 4294967295, %s747_s14   ;;  %s425_s16 = sadd.s32 4294967294, %s747_s14   ;;  %s747_s14 = sphi %s782_s14, %s19_s14   ;;  %s743_s13 = sphi %s780_s13, %s1000_s13   ;;  %s739_s12 = sphi %s778_s12, %s999_s12   ;;  %s735_s11 = sphi %s776_s11, %s998_s11   ;;  %s731_s10 = sphi %s774_s10, %s997_s10   ;;  %s727_s9 = sphi %s772_s9, %s996_s9  }
   0x8   : > { %p77_p0 = scmp.ne.s32.totalorder %s731_s10, %s727_s9  ;;  %p806_p1 = scmp.eq.s32.totalorder %s424_s15, 0 }
   0x9   : > { %p810_p2 = scmp.eq.s32.totalorder %s424_s15, 1  ;;  %p109_p3 = scmp.eq.s32.totalorder %s425_s16, 1 }
   0xa   : > { %p816_p4 = por %p806_p1, %p77_p0  ;;  %p426_p5 = scmp.ge.s32.totalorder %s747_s14, 1 }
   0xb   : > { %p821_p6 = por %p109_p3, %p77_p0  ;;  %p116_p7 = scmp.lt.s32.totalorder %s747_s14, 3 }
   0xc   : > { %s985_s19 = scalar_select %p816_p4, 1, 0 }
   0xd   : > { %s986_s20 = scalar_select %p821_p6, 1, 0 }
   0xe   : > { %p826_p8 = pnand %p426_p5, %p116_p7  ;;  %s749_s22 = smov [#allocation2]  }
   0xf   : > { %s131_s23 = sshll.u32 %s749_s22, 4  ;;  %s28_s25 = sadd.s32 1, %s743_s13  ;;  %s132_s23 = int_to_ptr.vmem [resolvable:$true] %s131_s23 }
  0x10   : > { %p539_p9 = pneg %p826_p8  ;;  %s620_s26 = scalar_lea.vmem %s132_s23, 512 }
  0x11   : > { %p621_p13 = scmp.ne.s32.totalorder %s132_s23, %s620_s26  ;;  %p628_p5 = scmp.lt.s32.totalorder %s132_s23, %s132_s23 }
  0x12   : > { %p835_p11 = pnand %p539_p9, %p806_p1  ;;  %p629_p7 = scmp.lt.s32.totalorder %s620_s26, %s620_s26 }
  0x14   : > { %p611_p12 = pneg %p835_p11  ;;  %p630_p6 = por %p629_p7, %p628_p5 }
  0x16   : > { %p623_p0 = pnand %p621_p13, %p611_p12 }
  0x18   : > { %p624_p3 = pneg %p623_p0 }
  0x1a   : > { %p631_p4 = pnand %p630_p6, %p624_p3 }
  0x1c   : > { %634 = shalt.err (!%p631_p4)
}
  0x1d   : > { %s982_s27 = smov 128   ;;  %s751_s28 = smov 8  }
  0x1e   : > { %542 = dma.hbm_to_vmem [thread:$0]  (!%p835_p11), %s978_s0, 512, %s132_s23, [#allocation3], %s982_s27, %s982_s27, %s751_s28  }
  0x1f   : > { %p29_p4 = scmp.ge.s32.totalorder %s28_s25, 2  ;;  %s64_s3 = sadd.s32 1, %s735_s11 }
  0x20   : > { %p71_p6 = scmp.ne.s32.totalorder %s735_s11, %s731_s10  ;;  %p72_p9 = scmp.eq.s32.totalorder %s747_s14, 0 }
  0x21   : > { %s1002_s25 = smov (%p29_p4, %s28_s25), 0  ;;  %p552_p0 = scmp.lt.s32.totalorder %s747_s14, 2 }
  0x22   : > { %p856_p12 = por %p72_p9, %p71_p6  ;;  %p862_p13 = por %p810_p2, %p71_p6 }
  0x23   : > { %s61_s6 = ssub.s32 %s743_s13, %s1002_s25  ;;  %s145_s7 = sand.u32 1, %s735_s11  }
  0x24   : > { %p62_p11 = scmp.eq.s32.totalorder %s61_s6, 0  ;;  %s429_s8 = sshll.u32 %s145_s7, 7 }
  0x25   : > { %s440_s16 = sshll.u32 %s743_s13, 11  ;;  %s149_s26 = scalar_lea.vmem [#allocation5], %s429_s8 }
  0x26   : > { %s871_s15 = scalar_select %p62_p11, %s735_s11, %s64_s3  }
  0x27   : > { %s155_s24 = scalar_lea.hbm %s979_s1, %s440_s16  ;;  %s156_s29 = sshll.u32 %s149_s26, 4  ;;  %s157_s29 = int_to_ptr.vmem [resolvable:$true] %s156_s29 }
  0x28   : > { %p879_p2 = pnand %p552_p0, %p856_p12  ;;  %s146_s30 = scalar_lea.sflag [#allocation6], %s145_s7 }
  0x29   : > { %s648_s6 = scalar_lea.vmem %s157_s29, 2048  ;;  %s752_s3 = smov [#allocation5]  }
  0x2a   : > { %p637_p3 = pneg %p879_p2  ;;  %p649_p5 = scmp.ne.s32.totalorder %s157_s29, %s648_s6 }
  0x2b   : > { %s653_s27 = sshll.u32 %s752_s3, 4  ;;  %s654_s27 = int_to_ptr.vmem [resolvable:$false] %s653_s27 }
  0x2c   : > { %p651_p7 = pnand %p649_p5, %p637_p3  ;;  %s655_s16 = scalar_lea.vmem %s654_s27, 4096 }
  0x2d   : > { %p656_p6 = scmp.lt.s32.totalorder %s157_s29, %s654_s27  ;;  %p657_p9 = scmp.lt.s32.totalorder %s655_s16, %s648_s6 }
  0x2e   : > { %p652_p4 = pneg %p651_p7 }
  0x2f   : > { %p658_p11 = por %p657_p9, %p656_p6 }
  0x31   : > { %p659_p10 = pnand %p658_p11, %p652_p4 }
  0x33   : > { %662 = shalt.err (!%p659_p10)
}
  0x34   : > { %s992_s4 = smov 128   ;;  %168 = sbr.rel (%p826_p8) target bundleno = 337 (0x151), region = 28 }
  0x35   : > { %546 = dma.hbm_to_vmem [thread:$0]  (!%p879_p2), %s155_s24, 2048, %s157_s29, %s146_s30, %s992_s4, %s992_s4, %s751_s28  }
  0x39   : > { %714 = dma.done.wait (%p806_p1), [#allocation3], 512  }
  0x3a   : > { %716 = vsyncadd (%p806_p1), [#allocation3], 4294966784  ;;  %s897_s27 = sand.u32 1, %s731_s10   ;;  %p993_p10 = scmp.ne.s32.totalorder %s985_s19, 0 }
  0x3b   : > { %s434_s7 = sshll.u32 %s897_s27, 7  ;;  %s175_s8 = scalar_lea.sflag [#allocation6], %s897_s27 }
  0x3c   : > { %s901_s22 = scalar_lea.vmem [#allocation5], %s434_s7 }
  0x3d   : > { %718 = dma.done.wait (%p993_p10), %s175_s8, 2048  }
  0x3e   : > { %720 = vsyncadd (%p993_p10), %s175_s8, 4294965248  ;;  %v221_v0 = vld [vmem:[%s901_s22 + $0x78] sm:$0xff]  ;;  %v220_v1 = vld [vmem:[%s901_s22 + $0x70] sm:$0xff]  ;;  %s435_s17 = sshll.u32 %s897_s27, 5  ;;  %s437_s28 = sshll.u32 %s739_s12, 7 }
  0x3f   : > { %461 = vmatprep.subr.mxu0 %v221_v0  ;;  %499 = vmatprep.subr.mxu1 %v221_v0  ;;  %v219_v2 = vld [vmem:[%s901_s22 + $0x68] sm:$0xff]  ;;  %v202_v3 = vld [vmem:[#allocation2] sm:$0xff]  ;;  %v204_v4 = vld [vmem:[#allocation2 + $0x10] sm:$0xff]  ;;  %s198_s19 = scalar_lea.vmem [#allocation7], %s435_s17  ;;  %s930_s26 = scalar_lea.hbm %s980_s2, %s437_s28 }
  0x40   : > { %462 = vmatpush3.xpose.msra.mxu0 %v221_v0  ;;  %515 = vmatpush3.xpose.msra.mxu1 %v221_v0  ;;  %v218_v5 = vld [vmem:[%s901_s22 + $0x60] sm:$0xff]  ;;  %v217_v6 = vld [vmem:[%s901_s22 + $0x58] sm:$0xff]  ;;  %v216_v7 = vld [vmem:[%s901_s22 + $0x50] sm:$0xff]  ;;  %s327_s21 = sshll.u32 %s198_s19, 4  ;;  %s312_s29 = scalar_lea.sflag [#allocation4], %s897_s27  ;;  %s925_s21 = int_to_ptr.vmem [resolvable:$true] %s327_s21 }
  0x41   : > { %463 = vmatprep.subr.mxu0 %v220_v1  ;;  %500 = vmatprep.subr.mxu1 %v220_v1  ;;  %v215_v8 = vld [vmem:[%s901_s22 + $0x48] sm:$0xff]  ;;  %v214_v9 = vld [vmem:[%s901_s22 + $0x40] sm:$0xff]  ;;  %v213_v10 = vld [vmem:[%s901_s22 + $0x38] sm:$0xff]  ;;  %s663_s12 = scalar_lea.vmem %s925_s21, 512  ;;  %s753_s18 = smov [#allocation7]  }
  0x42   : > { %493 = vmatprep.mubr.f32.mxu0 %v202_v3  ;;  %496 = vmatprep.mubr.f32.mxu1 %v204_v4  ;;  %v212_v11 = vld [vmem:[%s901_s22 + $0x30] sm:$0xff]  ;;  %v211_v12 = vld [vmem:[%s901_s22 + $0x28] sm:$0xff]  ;;  %v210_v13 = vld [vmem:[%s901_s22 + $0x20] sm:$0xff]  ;;  %p664_p1 = scmp.ne.s32.totalorder %s925_s21, %s663_s12  ;;  %s667_s30 = sshll.u32 %s753_s18, 4  ;;  %s668_s30 = int_to_ptr.vmem [resolvable:$false] %s667_s30 }
  0x43   : > { %v209_v14 = vld [vmem:[%s901_s22 + $0x18] sm:$0xff]  ;;  %v208_v15 = vld [vmem:[%s901_s22 + $0x10] sm:$0xff]  ;;  %v207_v16 = vld [vmem:[%s901_s22 + $0x8] sm:$0xff]  ;;  %s669_s6 = scalar_lea.vmem %s668_s30, 1024  ;;  %p670_p0 = scmp.lt.s32.totalorder %s925_s21, %s668_s30 }
  0x44   : > { %464 = vmatpush3.xpose.msra.mxu0 %v220_v1  ;;  %516 = vmatpush3.xpose.msra.mxu1 %v220_v1  ;;  %v206_v17 = vld [vmem:[%s901_s22] sm:$0xff]  ;;  %v203_v18 = vld [vmem:[#allocation2 + $0x8] sm:$0xff]  ;;  %v205_v19 = vld [vmem:[#allocation2 + $0x18] sm:$0xff]  ;;  %p665_p8 = pnand %p664_p1, %p862_p13  ;;  %p671_p2 = scmp.lt.s32.totalorder %s669_s6, %s663_s12 }
  0x45   : > { %465 = vmatprep.subr.mxu0 %v219_v2  ;;  %501 = vmatprep.subr.mxu1 %v219_v2 }
  0x46   : > { %p666_p12 = pneg %p665_p8  ;;  %p672_p3 = por %p671_p2, %p670_p0 }
  0x48   : > { %466 = vmatpush3.xpose.msra.mxu0 %v219_v2  ;;  %517 = vmatpush3.xpose.msra.mxu1 %v219_v2  ;;  %p673_p5 = pnand %p672_p3, %p666_p12 }
  0x49   : > { %467 = vmatprep.subr.mxu0 %v218_v5  ;;  %502 = vmatprep.subr.mxu1 %v218_v5 }
  0x4c   : > { %468 = vmatpush3.xpose.msra.mxu0 %v218_v5  ;;  %518 = vmatpush3.xpose.msra.mxu1 %v218_v5 }
  0x4d   : > { %469 = vmatprep.subr.mxu0 %v217_v6  ;;  %503 = vmatprep.subr.mxu1 %v217_v6 }
  0x50   : > { %470 = vmatpush3.xpose.msra.mxu0 %v217_v6  ;;  %519 = vmatpush3.xpose.msra.mxu1 %v217_v6 }
  0x51   : > { %471 = vmatprep.subr.mxu0 %v216_v7  ;;  %504 = vmatprep.subr.mxu1 %v216_v7 }
  0x54   : > { %472 = vmatpush3.xpose.msra.mxu0 %v216_v7  ;;  %520 = vmatpush3.xpose.msra.mxu1 %v216_v7 }
  0x55   : > { %473 = vmatprep.subr.mxu0 %v215_v8  ;;  %505 = vmatprep.subr.mxu1 %v215_v8 }
  0x58   : > { %474 = vmatpush3.xpose.msra.mxu0 %v215_v8  ;;  %521 = vmatpush3.xpose.msra.mxu1 %v215_v8 }
  0x59   : > { %475 = vmatprep.subr.mxu0 %v214_v9  ;;  %506 = vmatprep.subr.mxu1 %v214_v9 }
  0x5c   : > { %476 = vmatpush3.xpose.msra.mxu0 %v214_v9  ;;  %522 = vmatpush3.xpose.msra.mxu1 %v214_v9 }
  0x5d   : > { %477 = vmatprep.subr.mxu0 %v213_v10  ;;  %507 = vmatprep.subr.mxu1 %v213_v10 }
  0x60   : > { %478 = vmatpush3.xpose.msra.mxu0 %v213_v10  ;;  %523 = vmatpush3.xpose.msra.mxu1 %v213_v10 }
  0x61   : > { %479 = vmatprep.subr.mxu0 %v212_v11  ;;  %508 = vmatprep.subr.mxu1 %v212_v11 }
  0x64   : > { %480 = vmatpush3.xpose.msra.mxu0 %v212_v11  ;;  %524 = vmatpush3.xpose.msra.mxu1 %v212_v11 }
  0x65   : > { %481 = vmatprep.subr.mxu0 %v211_v12  ;;  %509 = vmatprep.subr.mxu1 %v211_v12 }
  0x68   : > { %482 = vmatpush3.xpose.msra.mxu0 %v211_v12  ;;  %525 = vmatpush3.xpose.msra.mxu1 %v211_v12 }
  0x69   : > { %483 = vmatprep.subr.mxu0 %v210_v13  ;;  %510 = vmatprep.subr.mxu1 %v210_v13 }
  0x6c   : > { %484 = vmatpush3.xpose.msra.mxu0 %v210_v13  ;;  %526 = vmatpush3.xpose.msra.mxu1 %v210_v13 }
  0x6d   : > { %485 = vmatprep.subr.mxu0 %v209_v14  ;;  %511 = vmatprep.subr.mxu1 %v209_v14 }
  0x70   : > { %486 = vmatpush3.xpose.msra.mxu0 %v209_v14  ;;  %527 = vmatpush3.xpose.msra.mxu1 %v209_v14 }
  0x71   : > { %487 = vmatprep.subr.mxu0 %v208_v15  ;;  %512 = vmatprep.subr.mxu1 %v208_v15 }
  0x74   : > { %488 = vmatpush3.xpose.msra.mxu0 %v208_v15  ;;  %528 = vmatpush3.xpose.msra.mxu1 %v208_v15 }
  0x75   : > { %489 = vmatprep.subr.mxu0 %v207_v16  ;;  %513 = vmatprep.subr.mxu1 %v207_v16 }
  0x78   : > { %490 = vmatpush3.xpose.msra.mxu0 %v207_v16  ;;  %529 = vmatpush3.xpose.msra.mxu1 %v207_v16 }
  0x79   : > { %491 = vmatprep.subr.mxu0 %v206_v17  ;;  %514 = vmatprep.subr.mxu1 %v206_v17 }
  0x7c   : > { %492 = vmatpush3.xpose.msra.mxu0 %v206_v17  ;;  %530 = vmatpush3.xpose.msra.mxu1 %v206_v17 }
  0x7f   : > { %494 = vmatmul.mubr.f32.vlgmr.msra.gmra.mxu0 %v203_v18  ;;  %497 = vmatmul.mubr.f32.vlgmr.msra.gmra.mxu1 %v205_v19 }
 0x13f   : > { %v495_v20 = vpop.f32.mrf.mxu0  ;;  %v498_v21 = vpop.f32.mrf.mxu1 }
 0x140   : > { %308 = vst [vmem:[%s198_s19 + $0x8] sm:$0xff] %v495_v20  ;;  %310 = vst [vmem:[%s198_s19 + $0x18] sm:$0xff] %v498_v21 }
 0x141   : > { %v288_v22 = vpop.f32.mrf.mxu0  ;;  %v298_v23 = vpop.f32.mrf.mxu1 }
 0x142   : > { %307 = vst [vmem:[%s198_s19] sm:$0xff] %v288_v22  ;;  %309 = vst [vmem:[%s198_s19 + $0x10] sm:$0xff] %v298_v23 }
 0x143   : > { %676 = shalt.err (!%p673_p5)
}
 0x144   : > { %s677_s3 = scalar_lea.hbm %s930_s26, 512  ;;  %s681_s7 = scalar_lea.hbm %s980_s2, 1024 }
 0x145   : > { %p678_p7 = scmp.ne.s32.totalorder %s930_s26, %s677_s3  ;;  %p682_p9 = scmp.lt.s32.totalorder %s930_s26, %s980_s2 }
 0x146   : > { %p683_p11 = scmp.lt.s32.totalorder %s681_s7, %s677_s3 }
 0x147   : > { %p679_p4 = pnand %p678_p7, %p862_p13 }
 0x148   : > { %p684_p10 = por %p683_p11, %p682_p9 }
 0x149   : > { %p680_p6 = pneg %p679_p4 }
 0x14b   : > { %p685_p1 = pnand %p684_p10, %p680_p6 }
 0x14d   : > { %688 = shalt.err (!%p685_p1)
}
 0x14e   : > { %s754_s17 = smov 128   ;;  %s755_s19 = smov 256  }
 0x14f   : > { %s756_s28 = smov 8  }
 0x150   : > { %537 = dma.vmem_to_hbm [thread:$0]  (%p862_p13), %s925_s21, 512, %s930_s26, %s312_s29, %s754_s17, %s755_s19, %s756_s28  }
 0x151 PF: > { %s342_s23 = sand.u32 1, %s727_s9   ;;  %p994_p8 = scmp.ne.s32.totalorder %s986_s20, 0 }
 0x152   : > { %p995_p12 = scmp.ge.s32.totalorder %s747_s14, 2  ;;  %s343_s24 = scalar_lea.sflag [#allocation4], %s342_s23 }
 0x154   : > { %p548_p0 = pnand %p995_p12, %p994_p8 }
 0x156   : > { %p549_p2 = pneg %p548_p0 }
 0x158   : > { %722 = dma.done.wait (%p549_p2), %s343_s24, 512  }
 0x159   : > { %724 = vsyncadd (%p549_p2), %s343_s24, 4294966784  ;;  %s19_s14 = sadd.s32 1, %s747_s14   ;;  %s996_s9 = smov %s731_s10 }
 0x15a   : > { %p16_p3 = scmp.ge.s32.totalorder %s19_s14, 4   ;;  %s997_s10 = smov %s735_s11 }
 0x15b   : > { %s998_s11 = smov %s871_s15  ;;  %s999_s12 = smov %s743_s13 }
 0x15c   : > { %s1000_s13 = smov %s1002_s25  ;;  %18 = sbr.rel (!%p16_p3) target bundleno = 7 (0x7), region = 79 }
 0x161   :  { %348 = vsyncpa [#allocation3], 1 }
 0x162   :  { %350 = vsyncpa [#allocation3 + $0x1], 1 }
 0x163   :  { %351 = vsyncpa [#allocation6], 1 }
 0x164   :  { %353 = vsyncpa [#allocation6 + $0x1], 1 }
 0x165   :  { %354 = vsyncpa [#allocation4], 1 }
 0x166   :  { %356 = vsyncpa [#allocation4 + $0x1], 1 }

</bundles_post_ra>
